<compile_context>
chip_gen: v7x
topology: tpu7x:2x2x1
jax: 0.10.0
libtpu: 0.0.40
codegen_flags: <defaults>
</compile_context>

<pallas_src>
import math

import jax
import jax.numpy as jnp
from jax.experimental import pallas as pl
from jax.experimental.pallas import tpu as pltpu

_LANE = 128  # TPU lane width (last-dim tiling unit)


def _round_up(x, m):
    return (x + m - 1) // m * m


# ----------------------------------------------------------------------------
# kernels
# ----------------------------------------------------------------------------

def _siren_kernel(x_ref, wt_ref, b_ref, o_ref):
    """Single full-K pass: MXU matmul (f32 accumulate) + bias + sine, fused."""
    acc = jnp.dot(x_ref[...].astype(wt_ref.dtype), wt_ref[...],
                  preferred_element_type=jnp.float32)
    o_ref[...] = jnp.sin(acc + b_ref[...]).astype(o_ref.dtype)


def _siren_kernel_ktiled(x_ref, wt_ref, b_ref, o_ref, acc_ref):
    """K-tiled variant for very large dim_in (innermost 'arbitrary' axis)."""
    k = pl.program_id(2)

    @pl.when(k == 0)
    def _():
        acc_ref[...] = jnp.zeros_like(acc_ref)

    acc_ref[...] += jnp.dot(x_ref[...].astype(wt_ref.dtype), wt_ref[...],
                            preferred_element_type=jnp.float32)

    @pl.when(k == pl.num_programs(2) - 1)
    def _():
        o_ref[...] = jnp.sin(acc_ref[...] + b_ref[...]).astype(o_ref.dtype)


# ----------------------------------------------------------------------------
# parameter init / prep (one-time, NOT per forward call)
# ----------------------------------------------------------------------------

def init_siren_params(key, dim_in, dim_out, w0=1.0, c=6.0, is_first=False,
                      use_bias=True):
    """Replicates Siren.init_: uniform in [-w_std, w_std]."""
    w_std = (1.0 / math.sqrt(dim_in)) if is_first else (math.sqrt(c / dim_in) / w0)
    kw, kb = jax.random.split(key)
    weight = jax.random.uniform(kw, (dim_out, dim_in), jnp.float32, -w_std, w_std)
    bias = (jax.random.uniform(kb, (dim_out,), jnp.float32, -w_std, w_std)
            if use_bias else None)
    return weight, bias


def prepare_siren_params(weight, bias, w0=1.0, compute_dtype=jnp.bfloat16):
    """One-time layout prep.

    * folds w0 into W and b:  sin(w0*(x W^T + b)) == sin(x (w0 W)^T + (w0 b))
    * transposes W -> (dim_in, dim_out)
    * pads ONLY dim_out to a multiple of 128 (lane-dense output stores); the
      K axis (dim_in) is left unpadded so x never has to be padded per forward
    * stores W^T in `compute_dtype` (bf16 default: native MXU dtype, half the
      weight bytes; accumulation stays f32 in the kernel)
    Returns (wt, bias_2d, dim_out).
    """
    dim_out, dim_in = weight.shape
    n_pad = _round_up(dim_out, _LANE)

    wt = (w0 * weight).T.astype(compute_dtype)               # (dim_in, dim_out)
    wt = jnp.pad(wt, ((0, 0), (0, n_pad - dim_out)))

    b = (w0 * bias) if bias is not None else jnp.zeros((dim_out,), jnp.float32)
    b2 = jnp.pad(b.astype(jnp.float32), (0, n_pad - dim_out)).reshape(1, n_pad)
    return wt, b2, dim_out


def _vmem_budget():
    """Generation-aware VMEM byte budget for the kernel's tiles."""
    try:
        cap = pltpu.get_tpu_info().vmem_capacity_bytes
    except Exception:
        cap = 128 << 20
    # v7x: 64 MiB per TensorCore -> leave headroom for compiler scratch.
    return (28 << 20) if cap <= (64 << 20) else (48 << 20)


# ----------------------------------------------------------------------------
# forward
# ----------------------------------------------------------------------------

def siren_forward(x, wt, b2, dim_out, *, tm_max=256, tn_max=512):
    """x: (B, dim_in).  (wt, b2, dim_out) from prepare_siren_params."""
    B, dim_in = x.shape
    K, N = wt.shape
    assert K == dim_in, "x feature dim must match prepared weight"

    x_elt = jnp.dtype(x.dtype).itemsize
    w_elt = jnp.dtype(wt.dtype).itemsize
    o_elt = x_elt
    budget = _vmem_budget()

    # ---- batch tile ---------------------------------------------------------
    if B <= tm_max:
        tm = B                               # full-dim block -> no batch pad
        if N <= tn_max and B % 16 == 0:
            tm = B // 2                      # >=2 parallel steps (v7x: 2 TCs)
    else:
        tm = tm_max                          # 256: MXU-row aligned on all gens

    # ---- output (lane) tile + optional K-reduction tile ---------------------
    def need_bytes(tm_, tn_, tk_):           # double-buffered tiles
        n = 2 * (tm_ * tk_ * x_elt + tk_ * tn_ * w_elt + tn_ * 4 + tm_ * tn_ * o_elt)
        if tk_ < K:
            n += tm_ * tn_ * 4               # f32 accumulator scratch
        return n

    tn_cands = [N] + [t for t in range(tn_max, _LANE - 1, -_LANE)
                      if t < N and N % t == 0]
    tk_cands = [K] + [t for t in range(_round_up(K, _LANE) - _LANE, _LANE - 1, -_LANE)
                      if K % t == 0]         # 128-multiple divisors of K

    tn, tk, fits = tn_cands[-1], tk_cands[-1], False
    for tn_c in tn_cands:                    # widest lane-dense output tile first
        for tk_c in tk_cands:                # prefer a single full-K pass
            if need_bytes(tm, tn_c, tk_c) <= budget:
                tn, tk, fits = tn_c, tk_c, True
                break
        if fits:
            break
    while not fits and tm > 8 and need_bytes(tm, tn, tk) > budget:
        tm = max(8, _round_up(tm // 2, 8))   # last resort: shrink batch tile

    B_pad = _round_up(B, tm)
    if B_pad != B:
        x = jnp.pad(x, ((0, B_pad - B), (0, 0)))   # batch tail only; K untouched

    gi, gj, gk = B_pad // tm, N // tn, K // tk
    need = need_bytes(tm, tn, tk)
    vmem_limit = int(min(max(need + (4 << 20), 16 << 20), budget + (16 << 20)))

    cost = pl.CostEstimate(
        flops=2 * B_pad * K * N,
        transcendentals=B_pad * N,
        bytes_accessed=B_pad * K * x_elt + K * N * w_elt + N * 4 + B_pad * N * o_elt,
    )

    if gk == 1:
        # Pick the grid order that minimizes HBM re-streaming:
        #   batch-outer -> W^T re-fetched once per batch tile
        #   N-outer     -> x   re-fetched once per output-column tile
        batch_outer_cost = B_pad * K * x_elt + gi * K * N * w_elt
        n_outer_cost = K * N * w_elt + gj * B_pad * K * x_elt
        if batch_outer_cost <= n_outer_cost:
            grid = (gi, gj)
            x_map = lambda i, j: (i, 0)
            w_map = lambda i, j: (0, j)
            o_map = lambda i, j: (i, j)
        else:
            grid = (gj, gi)
            x_map = lambda j, i: (i, 0)
            w_map = lambda j, i: (0, j)
            o_map = lambda j, i: (i, j)
        b_map = w_map
        kernel = _siren_kernel
        scratch = []
        semantics = ("parallel", "parallel")
        x_block, w_block = (tm, K), (K, tn)
    else:
        grid = (gi, gj, gk)
        x_map = lambda i, j, k: (i, k)
        w_map = lambda i, j, k: (k, j)
        b_map = lambda i, j, k: (0, j)
        o_map = lambda i, j, k: (i, j)
        kernel = _siren_kernel_ktiled
        scratch = [pltpu.VMEM((tm, tn), jnp.float32)]
        semantics = ("parallel", "parallel", "arbitrary")
        x_block, w_block = (tm, tk), (tk, tn)

    out = pl.pallas_call(
        kernel,
        out_shape=jax.ShapeDtypeStruct((B_pad, N), x.dtype),
        grid_spec=pltpu.PrefetchScalarGridSpec(
            num_scalar_prefetch=0,
            grid=grid,
            in_specs=[
                pl.BlockSpec(x_block, x_map),     # x batch tile (K unpadded)
                pl.BlockSpec(w_block, w_map),     # W^T column tile
                pl.BlockSpec((1, tn), b_map),     # bias slice
            ],
            out_specs=pl.BlockSpec((tm, tn), o_map),
            scratch_shapes=scratch,
        ),
        compiler_params=pltpu.CompilerParams(
            dimension_semantics=semantics,
            vmem_limit_bytes=vmem_limit,
        ),
        cost_estimate=cost,
    )(x, wt, b2)

    # Slice only when padding was actually introduced (for stacked layers, keep
    # the padded (B_pad, N) layout between layers and slice once at the end).
    if B_pad != B or N != dim_out:
        out = out[:B, :dim_out]
    return out


# ----------------------------------------------------------------------------
# self-test
# ----------------------------------------------------------------------------

if __name__ == "__main__":
    key = jax.random.PRNGKey(0)
    k_x, k_p = jax.random.split(key)

    B, dim_in, dim_out, w0 = 16, 32, 64, 2.0

    x = jax.random.normal(k_x, (B, dim_in), dtype=jnp.float32)
    weight, bias = init_siren_params(k_p, dim_in, dim_out, w0=w0, c=6.0,
                                     is_first=False)

    # Plain-JAX reference of the PyTorch forward: sin(w0 * (x @ W^T + b)).
    ref = jnp.sin(w0 * (jnp.dot(x, weight.T,
                                precision=jax.lax.Precision.HIGHEST) + bias))

    # f32 operand path: tight parity with the reference.
    wt32, b32, d_out = prepare_siren_params(weight, bias, w0=w0,
                                            compute_dtype=jnp.float32)
    out32 = jax.block_until_ready(siren_forward(x, wt32, b32, d_out))
    assert out32.shape == (B, dim_out)
    assert jnp.allclose(out32, ref, atol=2e-4, rtol=2e-4)

    # Default bf16 operand path (native MXU dtype, f32 accumulation).
    wt16, b16, d_out = prepare_siren_params(weight, bias, w0=w0)
    out16 = jax.block_until_ready(siren_forward(x, wt16, b16, d_out))
    assert out16.shape == (B, dim_out)
    assert jnp.allclose(out16, ref, atol=5e-2, rtol=0)

    print("KERNEL_OK")
</pallas_src>

<mosaic_0001>
module attributes {stable_mosaic.version = 11 : i64} {
  func.func @_siren_kernel(%arg0: i32, %arg1: i32, %arg2: memref<8x32xf32, #tpu.memory_space<vmem>>, %arg3: memref<32x128xf32, #tpu.memory_space<vmem>>, %arg4: memref<1x128xf32, #tpu.memory_space<vmem>>, %arg5: memref<8x128xf32, #tpu.memory_space<vmem>>) attributes {dimension_semantics = [#tpu.dimension_semantics<parallel>, #tpu.dimension_semantics<parallel>], iteration_bounds = array<i64: 1, 2>, scalar_prefetch = 0 : i64, scratch_operands = 0 : i64, tpu.core_type = #tpu.core_type<tc>, window_params = [{transform_indices = @transform_0, window_bounds = array<i64: 8, 32>}, {transform_indices = @transform_1, window_bounds = array<i64: 32, 128>}, {transform_indices = @transform_2, window_bounds = array<i64: 1, 128>}, {transform_indices = @transform_3, window_bounds = array<i64: 8, 128>}]} {
    %c0 = arith.constant 0 : index
    %c0_0 = arith.constant 0 : index
    %0 = vector.load %arg2[%c0, %c0_0] : memref<8x32xf32, #tpu.memory_space<vmem>>, vector<8x32xf32>
    %c0_1 = arith.constant 0 : index
    %c0_2 = arith.constant 0 : index
    %1 = vector.load %arg3[%c0_1, %c0_2] : memref<32x128xf32, #tpu.memory_space<vmem>>, vector<32x128xf32>
    %cst = arith.constant dense<0.000000e+00> : vector<8x128xf32>
    %2 = tpu.matmul %0, %1, %cst {dimension_numbers = #tpu.dot_dimension_numbers<[1], [0], [0], [1], [0, 0, 1, 1], [], []>} : vector<8x32xf32>, vector<32x128xf32>, vector<8x128xf32> -> vector<8x128xf32>
    %c0_3 = arith.constant 0 : index
    %c0_4 = arith.constant 0 : index
    %3 = vector.load %arg4[%c0_3, %c0_4] : memref<1x128xf32, #tpu.memory_space<vmem>>, vector<1x128xf32>
    %4 = vector.broadcast %3 : vector<1x128xf32> to vector<8x128xf32>
    %5 = arith.addf %2, %4 : vector<8x128xf32>
    %6 = math.sin %5 : vector<8x128xf32>
    %c0_5 = arith.constant 0 : index
    %c0_6 = arith.constant 0 : index
    %7 = vector.load %arg5[%c0_5, %c0_6] : memref<8x128xf32, #tpu.memory_space<vmem>>, vector<8x128xf32>
    tpu.vector_store %arg5[%c0_5, %c0_6], %6 {strides = array<i32>} : memref<8x128xf32, #tpu.memory_space<vmem>>, vector<8x128xf32>,
    return
  }
  func.func @transform_0(%arg0: i32, %arg1: i32) -> (i32, i32) {
    %c0_i32 = arith.constant 0 : i32
    %c0_i32_0 = arith.constant 0 : i32
    return %arg1, %c0_i32 : i32, i32
  }
  func.func @transform_1(%arg0: i32, %arg1: i32) -> (i32, i32) {
    %c0_i32 = arith.constant 0 : i32
    %c0_i32_0 = arith.constant 0 : i32
    return %c0_i32, %arg0 : i32, i32
  }
  func.func @transform_2(%arg0: i32, %arg1: i32) -> (i32, i32) {
    %c0_i32 = arith.constant 0 : i32
    %c0_i32_0 = arith.constant 0 : i32
    return %c0_i32, %arg0 : i32, i32
  }
  func.func @transform_3(%arg0: i32, %arg1: i32) -> (i32, i32) {
    %c0_i32 = arith.constant 0 : i32
    return %arg1, %arg0 : i32, i32
  }
}

</mosaic_0001>

<bundles_post_ra>
// kernel: tpu_custom_call.1
= control target key start
LH: loop header
LB: loop body
LE: loop exit
PB: predicated region body
PF: predicated region fallthrough
CT: control target
= control target key end

     0   :  { %8 = vsyncpa [#allocation3], 0  ;;  %s1103_s0 = inlined_call_operand.hbm [shape: f32[16,32], index: 0, kind: input, shape index: {}]   ;;  %s1104_s1 = inlined_call_operand.hbm [shape: f32[32,128], index: 1, kind: input, shape index: {}]   ;;  %s1105_s2 = inlined_call_operand.vmem [shape: f32[1,128], index: 2, kind: input, shape index: {}]   ;;  %s1106_s3 = inlined_call_operand.hbm [shape: f32[16,128], index: 3, kind: output, shape index: {}]  }
   0x1   :  { %10 = vsyncpa [#allocation3 + $0x1], 0 }
   0x2   :  { %11 = vsyncpa [#allocation6], 0 }
   0x3   :  { %12 = vsyncpa [#allocation4], 0 }
   0x4   :  { %14 = vsyncpa [#allocation4 + $0x1], 0  ;;  %s861_s12 = smov 0   ;;  %s863_s13 = smov 0  }
   0x5   :  { %s865_s14 = smov 0   ;;  %s867_s15 = smov 0  }
   0x6   :  { %s869_s16 = smov 0   ;;  %s871_s17 = smov 0  }
   0x7 LB: > { %s545_s18 = sadd.s32 4294967295, %s825_s17   ;;  %s546_s19 = sadd.s32 4294967294, %s825_s17   ;;  %s825_s17 = sphi %s871_s17, %s20_s17   ;;  %s821_s16 = sphi %s869_s16, %s1130_s16   ;;  %s817_s15 = sphi %s867_s15, %s1129_s15   ;;  %s813_s14 = sphi %s865_s14, %s1128_s14   ;;  %s809_s13 = sphi %s863_s13, %s1127_s13   ;;  %s805_s12 = sphi %s861_s12, %s1126_s12  }
   0x8   : > { %p52_p0 = scmp.ne.s32.totalorder %s809_s13, %s805_s12  ;;  %p895_p1 = scmp.eq.s32.totalorder %s545_s18, 0 }
   0x9   : > { %p899_p2 = scmp.eq.s32.totalorder %s545_s18, 1  ;;  %p136_p3 = scmp.eq.s32.totalorder %s546_s19, 1 }
   0xa   : > { %s1111_s20 = scalar_select %p895_p1, 1, 0 }
   0xb   : > { %s1112_s21 = scalar_select %p899_p2, 1, 0 }
   0xc   : > { %p905_p4 = por %p895_p1, %p52_p0  ;;  %p547_p5 = scmp.ge.s32.totalorder %s825_s17, 1 }
   0xd   : > { %p910_p6 = por %p136_p3, %p52_p0  ;;  %p143_p7 = scmp.lt.s32.totalorder %s825_s17, 3 }
   0xe   : > { %s1113_s22 = scalar_select %p905_p4, 1, 0 }
   0xf   : > { %s1114_s23 = scalar_select %p910_p6, 1, 0 }
  0x10   : > { %p915_p8 = pnand %p547_p5, %p143_p7  ;;  %s827_s25 = smov [#allocation5]  }
  0x11   : > { %s157_s26 = sshll.u32 %s827_s25, 4  ;;  %s29_s28 = sadd.s32 1, %s821_s16  ;;  %s158_s26 = int_to_ptr.vmem [resolvable:$true] %s157_s26 }
  0x12   : > { %s1115_s24 = scalar_select %p915_p8, 1, 0 }
  0x13   : > { %p601_p9 = pneg %p915_p8  ;;  %s681_s4 = scalar_lea.hbm %s1104_s1, 512 }
  0x14   : > { %p682_p12 = scmp.ne.s32.totalorder %s1104_s1, %s681_s4  ;;  %p688_p5 = scmp.lt.u32.totalorder %s681_s4, %s1104_s1 }
  0x15   : > { %p924_p11 = pnand %p601_p9, %p895_p1 }
  0x17   : > { %p683_p13 = pneg %p924_p11 }
  0x19   : > { %p684_p0 = pnand %p683_p13, %p682_p12 }
  0x1b   : > { %p685_p3 = pneg %p684_p0 }
  0x1d   : > { %p690_p7 = pnand %p688_p5, %p685_p3 }
  0x1f   : > { %693 = shalt.err (!%p690_p7)
}
  0x20   : > { %s694_s9 = scalar_lea.vmem %s158_s26, 512  ;;  %p702_p1 = scmp.lt.s32.totalorder %s158_s26, %s158_s26 }
  0x21   : > { %p695_p9 = scmp.ne.s32.totalorder %s158_s26, %s694_s9  ;;  %p703_p4 = scmp.lt.s32.totalorder %s694_s9, %s694_s9 }
  0x23   : > { %p697_p10 = pnand %p695_p9, %p683_p13  ;;  %p704_p8 = por %p703_p4, %p702_p1 }
  0x25   : > { %p698_p6 = pneg %p697_p10 }
  0x27   : > { %p705_p2 = pnand %p704_p8, %p698_p6 }
  0x29   : > { %708 = shalt.err (!%p705_p2)
}
  0x2a   : > { %s828_s10 = smov 128   ;;  %s829_s11 = smov 8  }
  0x2b   : > { %604 = dma.hbm_to_vmem [thread:$0]  (!%p924_p11), %s1104_s1, 512, %s158_s26, [#allocation6], %s828_s10, %s828_s10, %s829_s11  }
  0x2c   : > { %p30_p1 = scmp.ge.s32.totalorder %s29_s28, 2  ;;  %s39_s25 = sadd.s32 1, %s813_s14 }
  0x2d   : > { %p46_p2 = scmp.ne.s32.totalorder %s813_s14, %s809_s13  ;;  %p47_p4 = scmp.eq.s32.totalorder %s825_s17, 0 }
  0x2e   : > { %s1132_s28 = smov (%p30_p1, %s29_s28), 0  ;;  %p1118_p8 = scmp.ne.s32.totalorder %s1112_s21, 0 }
  0x2f   : > { %p951_p6 = por %p47_p4, %p46_p2  ;;  %s36_s27 = ssub.s32 %s821_s16, %s1132_s28 }
  0x30   : > { %p957_p10 = por %p1118_p8, %p46_p2  ;;  %p614_p12 = scmp.lt.s32.totalorder %s825_s17, 2 }
  0x31   : > { %p37_p11 = scmp.eq.s32.totalorder %s36_s27, 0  ;;  %s177_s26 = sand.u32 1, %s813_s14  }
  0x32   : > { %s551_s4 = sshll.u32 %s177_s26, 3  ;;  %s552_s6 = sshll.u32 %s821_s16, 7 }
  0x33   : > { %s966_s5 = scalar_select %p37_p11, %s813_s14, %s39_s25  }
  0x34   : > { %s972_s9 = scalar_lea.hbm %s1103_s0, %s552_s6  ;;  %s181_s21 = scalar_lea.vmem [#allocation2], %s551_s4 }
  0x35   : > { %s188_s10 = sshll.u32 %s181_s21, 4  ;;  %p978_p13 = pnand %p614_p12, %p951_p6  ;;  %s974_s10 = int_to_ptr.vmem [resolvable:$true] %s188_s10 }
  0x36   : > { %s178_s18 = scalar_lea.sflag [#allocation3], %s177_s26  ;;  %s709_s19 = scalar_lea.hbm %s972_s9, 128 }
  0x37   : > { %p710_p0 = scmp.ne.s32.totalorder %s972_s9, %s709_s19  ;;  %p711_p3 = pneg %p978_p13 }
  0x38   : > { %s714_s4 = scalar_lea.hbm %s1103_s0, 256  ;;  %p715_p9 = scmp.lt.u32.totalorder %s972_s9, %s1103_s0 }
  0x39   : > { %p712_p5 = pnand %p711_p3, %p710_p0  ;;  %p716_p1 = scmp.lt.u32.totalorder %s714_s4, %s709_s19 }
  0x3a   : > { %p718_p4 = scmp.lt.u32.totalorder %s709_s19, %s972_s9 }
  0x3b   : > { %p713_p7 = pneg %p712_p5  ;;  %p717_p2 = por %p716_p1, %p715_p9 }
  0x3d   : > { %p719_p6 = por %p718_p4, %p717_p2 }
  0x3f   : > { %p720_p8 = pnand %p719_p6, %p713_p7 }
  0x41   : > { %723 = shalt.err (!%p720_p8)
}
  0x42   : > { %s724_s26 = scalar_lea.vmem %s974_s10, 128  ;;  %s830_s7 = smov [#allocation2]  }
  0x43   : > { %p725_p12 = scmp.ne.s32.totalorder %s974_s10, %s724_s26  ;;  %s729_s8 = sshll.u32 %s830_s7, 4  ;;  %s730_s8 = int_to_ptr.vmem [resolvable:$false] %s729_s8 }
  0x44   : > { %s731_s21 = scalar_lea.vmem %s730_s8, 256  ;;  %p732_p5 = scmp.lt.s32.totalorder %s974_s10, %s730_s8 }
  0x45   : > { %p727_p11 = pnand %p725_p12, %p711_p3  ;;  %p733_p9 = scmp.lt.s32.totalorder %s731_s21, %s724_s26 }
  0x47   : > { %p728_p0 = pneg %p727_p11  ;;  %p734_p1 = por %p733_p9, %p732_p5 }
  0x49   : > { %p735_p2 = pnand %p734_p1, %p728_p0 }
  0x4b   : > { %738 = shalt.err (!%p735_p2)
}
  0x4c   : > { %608 = dma.hbm_to_vmem [thread:$0]  (!%p978_p13), %s972_s9, 128, %s974_s10, %s178_s18  }
  0x4d   : > { %p1121_p7 = scmp.ne.s32.totalorder %s1115_s24, 0 }
  0x4e   : > { %s1010_s19 = sand.u32 (!%p1121_p7), 1, %s809_s13   ;;  %p1122_p3 = scmp.ne.s32.totalorder (!%p1121_p7), %s1113_s22, 0 }
  0x4f   : > { %197 = sbr.rel (%p1121_p7) target bundleno = 408 (0x198), region = 32  ;;  %s554_s25 = sshll.u32 (!%p1121_p7), %s1010_s19, 3 }
  0x50   : > { %s200_s27 = scalar_lea.sflag (!%p1121_p7), [#allocation3], %s1010_s19  ;;  %s203_s4 = scalar_lea.vmem (!%p1121_p7), [#allocation2], %s554_s25 }
  0x56   : > { %792 = dma.done.wait (%p1122_p3), %s200_s27, 128  }
  0x57   : > { %794 = vsyncadd (%p1122_p3), %s200_s27, 4294967168  ;;  %p1123_p13 = scmp.ne.s32.totalorder %s1111_s20, 0 }
  0x59   : > { %796 = dma.done.wait (%p1123_p13), [#allocation6], 512  }
  0x5a   : > { %798 = vsyncadd (%p1123_p13), [#allocation6], 4294966784  ;;  %v831_v0 = vmov 0.0|0.0   ;;  %vm832_vm0 = vmmov 0   ;;  %v833_v1 = vmov 0.0   ;;  %v237_v2 = vld [vmem:[#allocation5] sm:$0xff] }
  0x5b   : > { %583 = vmatprep.subr.bf16.mxu0 %v831_v0  ;;  %580 = vmatprep.mubr.msk.f32.mxu0 %vm832_vm0, %v833_v1  ;;  %v238_v3 = vld [vmem:[#allocation5 + $0x8] sm:$0xff]  ;;  %v239_v4 = vld [vmem:[#allocation5 + $0x10] sm:$0xff]  ;;  %v240_v6 = vld [vmem:[#allocation5 + $0x18] sm:$0xff]  ;;  %vm248_vm1 = vcmask 261120   ;;  %v834_v23 = vmov 683565275  }
  0x5c   : > { %v584_v5 = vpack.c.bf16 %v238_v3, %v237_v2  ;;  %v587_v7 = vpack.c.bf16 %v240_v6, %v239_v4  ;;  %v236_v8 = vld [vmem:[%s203_s4] sm:$0xff]  ;;  %v835_v25 = vmov 2475754826   ;;  %v836_v28 = vmov 2131351028   ;;  %s564_s24 = sshll.u32 %s817_s15, 7 }
  0x5d   : > { %v557_v9 = vld [vmem:[%s1105_s2] ss:$0 sm:$0xff]  ;;  %v837_v31 = vmov 2102212464   ;;  %v838_v34 = vmov 920167782   ;;  %s1054_s29 = scalar_lea.hbm %s1106_s3, %s564_s24 }
  0x5e   : > { %585 = vmatpush3.bf16.msra.mxu0 %v584_v5  ;;  %v839_v37 = vmov 1326507024   ;;  %s232_s9 = scalar_lea.vmem [#allocation7], %s554_s25  ;;  %s428_s15 = scalar_lea.sflag [#allocation4], %s1010_s19 }
  0x5f   : > { %586 = vmatprep.subr.bf16.mxu0 %v831_v0  ;;  %s442_s10 = sshll.u32 %s232_s9, 4  ;;  %s840_s26 = smov [#allocation7]   ;;  %s1056_s10 = int_to_ptr.vmem [resolvable:$true] %s442_s10 }
  0x60   : > { %s739_s6 = scalar_lea.vmem %s1056_s10, 128  ;;  %s743_s7 = sshll.u32 %s840_s26, 4  ;;  %s744_s7 = int_to_ptr.vmem [resolvable:$false] %s743_s7 }
  0x61   : > { %p740_p4 = scmp.ne.s32.totalorder %s1056_s10, %s739_s6  ;;  %s745_s8 = scalar_lea.vmem %s744_s7, 256 }
  0x62   : > { %588 = vmatpush3.bf16.msra.mxu0 %v587_v7  ;;  %p746_p12 = scmp.lt.s32.totalorder %s1056_s10, %s744_s7  ;;  %p747_p11 = scmp.lt.s32.totalorder %s745_s8, %s739_s6 }
  0x63   : > { %p741_p6 = pnand %p740_p4, %p957_p10 }
  0x64   : > { %p748_p0 = por %p747_p11, %p746_p12 }
  0x65   : > { %581 = vmatmul.mubr.msk.f32.vlgmr.msra.gmra.mrb[0].mxu0 %vm248_vm1, %v236_v8  ;;  %p742_p8 = pneg %p741_p6 }
  0x67   : > { %p749_p5 = pnand %p748_p0, %p742_p8 }
 0x138   : > { %v318_v10 = vpop.f32.mrb[0].mxu0 }
 0x139   : > { %v1027_v11 = vadd.f32 %v557_v9, %v318_v10  ;;  %v582_v12 = vpop.f32.mrb[1].mxu0 }
 0x13b   : > { %v325_v13 = vand.u32 2139095040, %v1027_v11  ;;  %v322_v17 = vand.u32 2147483647, %v1027_v11  ;;  %vm324_vm9 = vcmp.lt.s32.totalorder %v1027_v11, 0  ;;  %vm414_vm14 = vweird.f32 %v1027_v11 }
 0x13d   : > { %v326_v14 = vshrl.u32 %v325_v13, 23  ;;  %v329_v20 = vand.u32 8388607, %v322_v17  ;;  %vm323_vm10 = vcmp.le.f32.partialorder %v322_v17, 0.7853982 }
 0x13f   : > { %v559_v15 = vadd.s32 4294967169, %v326_v14  ;;  %v330_v39 = vor.u32 8388608, %v329_v20 }
 0x141   : > { %v332_v16 = vadd.s32 1, %v559_v15  ;;  %v370_v53 = vshll.u32 %v330_v39, 8 }
 0x143   : > { %vm333_vm2 = vcmp.gt.s32.totalorder %v332_v16, 0 }
 0x144   : > { %v334_v18 = vsel %vm333_vm2, %v332_v16, 0 }
 0x145   : > { %v336_v19 = vand.u32 31, %v334_v18  ;;  %v335_v22 = vshrl.u32 %v334_v18, 5 }
 0x147   : > { %v337_v21 = vsub.s32 32, %v336_v19  ;;  %v339_v24 = vshll.u32 %v834_v23, %v336_v19  ;;  %v342_v26 = vshll.u32 %v835_v25, %v336_v19  ;;  %v345_v30 = vshll.u32 %v836_v28, %v336_v19 }
 0x148   : > { %v348_v33 = vshll.u32 %v837_v31, %v336_v19  ;;  %v351_v36 = vshll.u32 %v838_v34, %v336_v19  ;;  %vm354_vm3 = vcmp.lt.s32.totalorder %v335_v22, 1  ;;  %vm357_vm4 = vcmp.lt.s32.totalorder %v335_v22, 4 }
 0x149   : > { %v340_v27 = vshrl.u32 %v835_v25, %v337_v21  ;;  %v343_v29 = vshrl.u32 %v836_v28, %v337_v21  ;;  %v346_v32 = vshrl.u32 %v837_v31, %v337_v21  ;;  %v349_v35 = vshrl.u32 %v838_v34, %v337_v21 }
 0x14a   : > { %v352_v38 = vshrl.u32 %v839_v37, %v337_v21  ;;  %v338_v48 = vshrl.u32 %v834_v23, %v337_v21  ;;  %vm356_vm5 = vcmp.lt.s32.totalorder %v335_v22, 3  ;;  %vm355_vm6 = vcmp.lt.s32.totalorder %v335_v22, 2 }
 0x14b   : > { %v341_v40 = vor.u32 %v340_v27, %v339_v24  ;;  %v344_v41 = vor.u32 %v343_v29, %v342_v26  ;;  %v347_v42 = vor.u32 %v346_v32, %v345_v30  ;;  %v350_v43 = vor.u32 %v349_v35, %v348_v33 }
 0x14c   : > { %v353_v44 = vor.u32 %v352_v38, %v351_v36 }
 0x14d   : > { %v359_v45 = vsel %vm357_vm4, %v347_v42, 2102212464  ;;  %v362_v46 = vsel %vm354_vm3, %v341_v40, %v344_v41  ;;  %v366_v47 = vsel %vm354_vm3, %v344_v41, %v347_v42  ;;  %v363_v49 = vsel %vm357_vm4, %v350_v43, 920167782 }
 0x14e   : > { %v367_v50 = vsel %vm357_vm4, %v353_v44, 1326507024  ;;  %v364_v51 = vsel %vm356_vm5, %v347_v42, %v363_v49  ;;  %v358_v54 = vsel %vm354_vm3, %v338_v48, %v341_v40  ;;  %v360_v55 = vsel %vm356_vm5, %v344_v41, %v359_v45 }
 0x14f   : > { %v368_v52 = vsel %vm356_vm5, %v350_v43, %v367_v50  ;;  %v365_v56 = vsel %vm355_vm6, %v362_v46, %v364_v51  ;;  %v361_v62 = vsel %vm355_vm6, %v358_v54, %v360_v55 }
 0x150   : > { %v369_v57 = vsel %vm355_vm6, %v366_v47, %v368_v52  ;;  %v1036_v60 = vmul.u32.u64.low %v370_v53, %v365_v56  ;;  %v1037_v61 = vmul.u32.u64.high %v370_v53, %v365_v56, %v1036_v60  ;;  %v377_v0 = vmul.u32 %v370_v53, %v361_v62 }
 0x151   : > { %v1033_v58 = vmul.u32.u64.low %v370_v53, %v369_v57  ;;  %v1034_v59 = vmul.u32.u64.high %v370_v53, %v369_v57, %v1033_v58 }
 0x152   : > { %v380_v63 = vadd.s32 1, %v1037_v61 }
 0x153   : > { %vm379_vm7 = vc.u32 %v1034_v59, %v1036_v60  ;;  %v378_v13 = vadd.s32 %v1036_v60, %v1034_v59 }
 0x154   : > { %v381_v1 = vsel %vm379_vm7, %v380_v63, %v1037_v61 }
 0x155   : > { %v382_v2 = vadd.s32 %v381_v1, %v377_v0 }
 0x157   : > { %v383_v3 = vadd.s32 536870912, %v382_v2 }
 0x159   : > { %v384_v4 = vshrl.u32 %v383_v3, 30 }
 0x15b   : > { %v385_v5 = vshll.u32 %v384_v4, 30  ;;  %v408_v26 = vsub.s32 4, %v384_v4 }
 0x15d   : > { %v386_v6 = vsub.s32 %v382_v2, %v385_v5  ;;  %v409_v29 = vsel %vm324_vm9, %v408_v26, %v384_v4 }
 0x15e   : > { %v411_v31 = vsel %vm323_vm10, 0, %v409_v29 }
 0x15f   : > { %v388_v7 = vsub.s32 0, %v386_v6  ;;  %v415_v32 = vadd.s32 3, %v411_v31 }
 0x161   : > { %v560_v8 = vmin.u32 %v388_v7, %v386_v6  ;;  %v416_v33 = vand.u32 3, %v415_v32 }
 0x163   : > { %v390_v9 = vclz %v560_v8  ;;  %vm421_vm11 = vcmp.eq.s32.totalorder %v416_v33, 2  ;;  %vm418_vm12 = vcmp.eq.s32.totalorder %v416_v33, 0  ;;  %vm417_vm13 = vcmp.lt.s32.totalorder %v416_v33, 2 }
 0x165   : > { %v561_v10 = vadd.s32 4294967294, %v390_v9 }
 0x167   : > { %vm562_vm8 = vcmp.lt.s32.totalorder %v561_v10, 0 }
 0x168   : > { %v393_v12 = vsel %vm562_vm8, 0, %v561_v10 }
 0x169   : > { %v394_v14 = vsub.s32 32, %v393_v12  ;;  %v398_v15 = vsub.s32 4294967266, %v393_v12  ;;  %v395_v16 = vshll.u32 %v386_v6, %v393_v12 }
 0x16b   : > { %v396_v18 = vshrl.u32 %v378_v13, %v394_v14  ;;  %v399_v19 = vadd.s32 127, %v398_v15 }
 0x16d   : > { %v397_v20 = vor.u32 %v396_v18, %v395_v16  ;;  %v400_v21 = vshll.u32 %v399_v19, 23 }
 0x16f   : > { %v401_v22 = vor.u32 4788187, %v400_v21  ;;  %v404_v24 = vcvt.s32.f32 %v397_v20 }
 0x171   : > { %v402_v23 = vand.u32 2147483647, %v401_v22 }
 0x173   : > { %v405_v25 = vmul.f32 %v404_v24, %v402_v23 }
 0x175   : > { %v406_v27 = vxor.u32 2147483648, %v405_v25 }
 0x177   : > { %v407_v28 = vsel %vm324_vm9, %v406_v27, %v405_v25 }
 0x178   : > { %v410_v30 = vsel %vm323_vm10, %v1027_v11, %v407_v28 }
 0x179   : > { %677 = vcosq.f32 %v410_v30 }
 0x17a   : > { %679 = vsinq.f32 %v410_v30 }
 0x183   : > { %v678_v34 = vpop.eup %677 }
 0x184   : > { %v680_v35 = vpop.eup %679  ;;  %v422_v36 = vxor.u32 2147483648, %v678_v34 }
 0x185   : > { %v419_v37 = vxor.u32 2147483648, %v680_v35 }
 0x186   : > { %v423_v17 = vsel %vm421_vm11, %v422_v36, %v680_v35 }
 0x187   : > { %v420_v38 = vsel %vm418_vm12, %v678_v34, %v419_v37 }
 0x188   : > { %v424_v39 = vsel %vm417_vm13, %v420_v38, %v423_v17 }
 0x189   : > { %v425_v40 = vsel %vm414_vm14, nan, %v424_v39 }
 0x18a   : > { %426 = vst [vmem:[%s232_s9] sm:$0xff] %v425_v40 }
 0x18b   : > { %752 = shalt.err (!%p749_p5)
}
 0x18c   : > { %s753_s21 = scalar_lea.hbm %s1054_s29, 128  ;;  %s757_s27 = scalar_lea.hbm %s1106_s3, 256 }
 0x18d   : > { %p754_p9 = scmp.ne.s32.totalorder %s1054_s29, %s753_s21  ;;  %p758_p7 = scmp.lt.u32.totalorder %s1054_s29, %s1106_s3 }
 0x18e   : > { %p759_p3 = scmp.lt.u32.totalorder %s757_s27, %s753_s21  ;;  %p761_p4 = scmp.lt.u32.totalorder %s753_s21, %s1054_s29 }
 0x18f   : > { %p755_p1 = pnand %p754_p9, %p957_p10 }
 0x190   : > { %p760_p13 = por %p759_p3, %p758_p7 }
 0x191   : > { %p756_p2 = pneg %p755_p1 }
 0x192   : > { %p762_p6 = por %p761_p4, %p760_p13 }
 0x194   : > { %p763_p8 = pnand %p762_p6, %p756_p2 }
 0x196   : > { %766 = shalt.err (!%p763_p8)
}
 0x197   : > { %599 = dma.vmem_to_hbm [thread:$0]  (%p957_p10), %s1056_s10, 128, %s1054_s29, %s428_s15  }
 0x198 PF: > { %s454_s20 = sand.u32 1, %s805_s12   ;;  %p1124_p12 = scmp.ne.s32.totalorder %s1114_s23, 0 }
 0x199   : > { %p1125_p11 = scmp.ge.s32.totalorder %s825_s17, 2  ;;  %s455_s24 = scalar_lea.sflag [#allocation4], %s454_s20 }
 0x19b   : > { %p610_p0 = pnand %p1125_p11, %p1124_p12 }
 0x19d   : > { %800 = dma.done.wait (!%p610_p0), %s455_s24, 128  }
 0x19e   : > { %802 = vsyncadd (!%p610_p0), %s455_s24, 4294967168  ;;  %s20_s17 = sadd.s32 1, %s825_s17   ;;  %s1126_s12 = smov %s809_s13 }
 0x19f   : > { %p17_p5 = scmp.ge.s32.totalorder %s20_s17, 4   ;;  %s1127_s13 = smov %s813_s14 }
 0x1a0   : > { %s1128_s14 = smov %s966_s5  ;;  %s1129_s15 = smov %s821_s16 }
 0x1a1   : > { %s1130_s16 = smov %s1132_s28  ;;  %19 = sbr.rel (!%p17_p5) target bundleno = 7 (0x7), region = 85 }
 0x1a8   :  { %460 = vsyncpa [#allocation3], 1 }
 0x1a9   :  { %462 = vsyncpa [#allocation3 + $0x1], 1 }
 0x1aa   :  { %463 = vsyncpa [#allocation6], 1 }
 0x1ab   :  { %464 = vsyncpa [#allocation4], 1 }
 0x1ac   :  { %466 = vsyncpa [#allocation4 + $0x1], 1 }

</bundles_post_ra>
